<compile_context>
chip_gen: v7x
topology: tpu7x:2x2x1
jax: 0.10.0
libtpu: 0.0.40
codegen_flags: <defaults>
</compile_context>

<pallas_src>
import functools

import jax
import jax.numpy as jnp
from jax import lax
from jax.experimental import pallas as pl
from jax.experimental.pallas import tpu as pltpu


# ------------------------------------------------------------------ kernel

def downsample_kernel(xph_ref, w_ref, b_ref, out_ref, *, ho, wo):
    """3x3 / stride-2 conv over an asymmetrically zero-padded input.

    xph_ref: (4*N, Hq, Wq, Cin)  2x2 stride-phase planes of the padded input:
             xph[(pr*2+pc)*N + n, hh, ww, ci] = xpad[n, ci, 2*hh + pr, 2*ww + pc]
    w_ref:   (Cout, 9*Cin)       conv weight, tap-major / channel-minor
    b_ref:   (Cout, 1)           bias (broadcast over lanes)
    out_ref: (Cout, N*Ho*Wo)     lane-dense output (128 lanes at the test shape)
    """
    pn = xph_ref.shape[0]
    cin = xph_ref.shape[3]
    n = pn // 4
    l = n * ho * wo

    # im2col: 9 contiguous tap slices -> (L, 9*Cin) patch matrix.
    # Tap (dh, dw) of the stride-2 conv reads xpad[2*oh+dh, 2*ow+dw], which is
    # phase (dh%2, dw%2) at offset (dh//2, dw//2) — a plain static slice.
    cols = []
    for dh in range(3):
        for dw in range(3):
            p = (dh % 2) * 2 + (dw % 2)          # which stride phase
            a, c = dh // 2, dw // 2              # offset inside the phase plane
            t = xph_ref[p * n:(p + 1) * n, a:a + ho, c:c + wo, :]   # (N, Ho, Wo, Cin)
            # merge leading dims only (minor dim Cin untouched) -> cheap reshape
            cols.append(t.reshape(l, cin).astype(jnp.float32))
    patches = jnp.concatenate(cols, axis=1)      # (L, 9*Cin)

    # Single MXU matmul:  (Cout, 9*Cin) x (L, 9*Cin)^T  ->  (Cout, L)
    acc = lax.dot_general(
        w_ref[...].astype(jnp.float32), patches,
        dimension_numbers=(((1,), (1,)), ((), ())),
        preferred_element_type=jnp.float32)
    out_ref[...] = (acc + b_ref[...].astype(jnp.float32)).astype(out_ref.dtype)


# ------------------------------------------------------------------ wrapper

def downsample_pallas(x_nchw, w_oihw, b):
    """Equivalent of the PyTorch Downsample.forward (NCHW in / NCHW out)."""
    N, Cin, H, W = x_nchw.shape
    Cout = w_oihw.shape[0]

    Hp, Wp = H + 1, W + 1                        # PyTorch pad (0,1,0,1): bottom/right
    Ho = (Hp - 3) // 2 + 1
    Wo = (Wp - 3) // 2 + 1
    # Pad up to even spatial dims so the stride-2 phase split is exact; the extra
    # zero row/col (beyond the PyTorch pad) is never read by a valid conv window.
    Hp2, Wp2 = Hp + (Hp % 2), Wp + (Wp % 2)
    Hq, Wq = Hp2 // 2, Wp2 // 2

    # ---- layout plumbing (wrapper side, per review) ----------------------
    # zero-pad, NCHW -> NHWC, then split into 2x2 stride phases so every conv
    # tap in the kernel is a contiguous slice (no strided lane gathers).
    xpad = jnp.pad(x_nchw, ((0, 0), (0, 0), (0, Hp2 - H), (0, Wp2 - W)))
    x_nhwc = jnp.transpose(xpad, (0, 2, 3, 1))                    # (N, Hp2, Wp2, Cin)
    xr = x_nhwc.reshape(N, Hq, 2, Wq, 2, Cin)
    xph = jnp.transpose(xr, (2, 4, 0, 1, 3, 5)).reshape(4 * N, Hq, Wq, Cin)

    # conv weight (Cout, Cin, 3, 3) -> (Cout, 9*Cin), tap-major / channel-minor
    wm = jnp.transpose(w_oihw, (0, 2, 3, 1)).reshape(Cout, 9 * Cin)
    b2 = b.reshape(Cout, 1)

    L = N * Ho * Wo
    kernel = functools.partial(downsample_kernel, ho=Ho, wo=Wo)

    out2d = pl.pallas_call(
        kernel,
        out_shape=jax.ShapeDtypeStruct((Cout, L), x_nchw.dtype),
        grid=(1,),                                # whole (tiny) problem in one step
        in_specs=[
            pl.BlockSpec((4 * N, Hq, Wq, Cin), lambda i: (0, 0, 0, 0)),
            pl.BlockSpec((Cout, 9 * Cin), lambda i: (0, 0)),
            pl.BlockSpec((Cout, 1), lambda i: (0, 0)),
        ],
        out_specs=pl.BlockSpec((Cout, L), lambda i: (0, 0)),
        compiler_params=pltpu.CompilerParams(
            dimension_semantics=("parallel",)),   # step is independent; harmless at grid=1
    )(xph, wm, b2)

    # (Cout, N*Ho*Wo) -> (N, Cout, Ho, Wo)
    return jnp.transpose(out2d.reshape(Cout, N, Ho, Wo), (1, 0, 2, 3))


# ------------------------------------------------------------------ pure-JAX reference

def downsample_ref(x_nchw, w_oihw, b):
    xpad = jnp.pad(x_nchw, ((0, 0), (0, 0), (0, 1), (0, 1)))      # F.pad(x, (0,1,0,1))
    y = lax.conv_general_dilated(
        xpad, w_oihw, window_strides=(2, 2), padding="VALID",
        dimension_numbers=("NCHW", "OIHW", "NCHW"))
    return y + b.reshape(1, -1, 1, 1)


# ------------------------------------------------------------------ main

if __name__ == "__main__":
    N, C, H, W = 2, 4, 16, 16
    key = jax.random.PRNGKey(0)
    kx, kw, kb = jax.random.split(key, 3)

    x = jax.random.normal(kx, (N, C, H, W), jnp.float32)          # PyTorch-style NCHW
    w = 0.1 * jax.random.normal(kw, (C, C, 3, 3), jnp.float32)    # Conv2d weight (OIHW)
    b = 0.1 * jax.random.normal(kb, (C,), jnp.float32)            # Conv2d bias

    out = downsample_pallas(x, w, b)
    out = jax.block_until_ready(out)

    ref = downsample_ref(x, w, b)
    assert out.shape == (N, C, H // 2, W // 2), out.shape
    max_err = float(jnp.max(jnp.abs(out - ref)))
    assert jnp.allclose(out, ref, rtol=1e-4, atol=1e-4), max_err

    print("KERNEL_OK")
</pallas_src>

<mosaic_0001>
module attributes {stable_mosaic.version = 11 : i64} {
  func.func @downsample_kernel(%arg0: i32, %arg1: memref<8x9x9x4xf32, #tpu.memory_space<vmem>>, %arg2: memref<4x36xf32, #tpu.memory_space<vmem>>, %arg3: memref<4x1xf32, #tpu.memory_space<vmem>>, %arg4: memref<4x128xf32, #tpu.memory_space<vmem>>) attributes {dimension_semantics = [#tpu.dimension_semantics<parallel>], iteration_bounds = array<i64: 1>, scalar_prefetch = 0 : i64, scratch_operands = 0 : i64, tpu.core_type = #tpu.core_type<tc>, window_params = [{pipeline_mode = #tpu.pipeline_mode<synchronous>, transform_indices = @transform_0, window_bounds = array<i64: 8, 9, 9, 4>}, {pipeline_mode = #tpu.pipeline_mode<synchronous>, transform_indices = @transform_1, window_bounds = array<i64: 4, 36>}, {pipeline_mode = #tpu.pipeline_mode<synchronous>, transform_indices = @transform_2, window_bounds = array<i64: 4, 1>}, {pipeline_mode = #tpu.pipeline_mode<synchronous>, transform_indices = @transform_3, window_bounds = array<i64: 4, 128>}]} {
    %c0 = arith.constant 0 : index
    %c0_0 = arith.constant 0 : index
    %c0_1 = arith.constant 0 : index
    %c0_2 = arith.constant 0 : index
    %0 = vector.load %arg1[%c0, %c0_0, %c0_1, %c0_2] : memref<8x9x9x4xf32, #tpu.memory_space<vmem>>, vector<2x8x8x4xf32>
    %1 = vector.shape_cast %0 : vector<2x8x8x4xf32> to vector<128x4xf32>
    %c2 = arith.constant 2 : index
    %c0_3 = arith.constant 0 : index
    %c0_4 = arith.constant 0 : index
    %c0_5 = arith.constant 0 : index
    %2 = vector.load %arg1[%c2, %c0_3, %c0_4, %c0_5] : memref<8x9x9x4xf32, #tpu.memory_space<vmem>>, vector<2x8x8x4xf32>
    %3 = vector.shape_cast %2 : vector<2x8x8x4xf32> to vector<128x4xf32>
    %c0_6 = arith.constant 0 : index
    %c0_7 = arith.constant 0 : index
    %c1 = arith.constant 1 : index
    %c0_8 = arith.constant 0 : index
    %4 = vector.load %arg1[%c0_6, %c0_7, %c1, %c0_8] : memref<8x9x9x4xf32, #tpu.memory_space<vmem>>, vector<2x8x8x4xf32>
    %5 = vector.shape_cast %4 : vector<2x8x8x4xf32> to vector<128x4xf32>
    %c4 = arith.constant 4 : index
    %c0_9 = arith.constant 0 : index
    %c0_10 = arith.constant 0 : index
    %c0_11 = arith.constant 0 : index
    %6 = vector.load %arg1[%c4, %c0_9, %c0_10, %c0_11] : memref<8x9x9x4xf32, #tpu.memory_space<vmem>>, vector<2x8x8x4xf32>
    %7 = vector.shape_cast %6 : vector<2x8x8x4xf32> to vector<128x4xf32>
    %c6 = arith.constant 6 : index
    %c0_12 = arith.constant 0 : index
    %c0_13 = arith.constant 0 : index
    %c0_14 = arith.constant 0 : index
    %8 = vector.load %arg1[%c6, %c0_12, %c0_13, %c0_14] : memref<8x9x9x4xf32, #tpu.memory_space<vmem>>, vector<2x8x8x4xf32>
    %9 = vector.shape_cast %8 : vector<2x8x8x4xf32> to vector<128x4xf32>
    %c4_15 = arith.constant 4 : index
    %c0_16 = arith.constant 0 : index
    %c1_17 = arith.constant 1 : index
    %c0_18 = arith.constant 0 : index
    %10 = vector.load %arg1[%c4_15, %c0_16, %c1_17, %c0_18] : memref<8x9x9x4xf32, #tpu.memory_space<vmem>>, vector<2x8x8x4xf32>
    %11 = vector.shape_cast %10 : vector<2x8x8x4xf32> to vector<128x4xf32>
    %c0_19 = arith.constant 0 : index
    %c1_20 = arith.constant 1 : index
    %c0_21 = arith.constant 0 : index
    %c0_22 = arith.constant 0 : index
    %12 = vector.load %arg1[%c0_19, %c1_20, %c0_21, %c0_22] : memref<8x9x9x4xf32, #tpu.memory_space<vmem>>, vector<2x8x8x4xf32>
    %13 = vector.shape_cast %12 : vector<2x8x8x4xf32> to vector<128x4xf32>
    %c2_23 = arith.constant 2 : index
    %c1_24 = arith.constant 1 : index
    %c0_25 = arith.constant 0 : index
    %c0_26 = arith.constant 0 : index
    %14 = vector.load %arg1[%c2_23, %c1_24, %c0_25, %c0_26] : memref<8x9x9x4xf32, #tpu.memory_space<vmem>>, vector<2x8x8x4xf32>
    %15 = vector.shape_cast %14 : vector<2x8x8x4xf32> to vector<128x4xf32>
    %c0_27 = arith.constant 0 : index
    %c1_28 = arith.constant 1 : index
    %c1_29 = arith.constant 1 : index
    %c0_30 = arith.constant 0 : index
    %16 = vector.load %arg1[%c0_27, %c1_28, %c1_29, %c0_30] : memref<8x9x9x4xf32, #tpu.memory_space<vmem>>, vector<2x8x8x4xf32>
    %17 = vector.shape_cast %16 : vector<2x8x8x4xf32> to vector<128x4xf32>
    %18 = tpu.concatenate %1, %3, %5, %7, %9, %11, %13, %15, %17 in 1 : vector<128x4xf32>, vector<128x4xf32>, vector<128x4xf32>, vector<128x4xf32>, vector<128x4xf32>, vector<128x4xf32>, vector<128x4xf32>, vector<128x4xf32>, vector<128x4xf32> -> vector<128x36xf32>
    %c0_31 = arith.constant 0 : index
    %c0_32 = arith.constant 0 : index
    %19 = vector.load %arg2[%c0_31, %c0_32] : memref<4x36xf32, #tpu.memory_space<vmem>>, vector<4x36xf32>
    %cst = arith.constant dense<0.000000e+00> : vector<4x128xf32>
    %20 = tpu.matmul %19, %18, %cst {dimension_numbers = #tpu.dot_dimension_numbers<[1], [1], [0], [0], [0, 0, 1, 0], [], []>} : vector<4x36xf32>, vector<128x36xf32>, vector<4x128xf32> -> vector<4x128xf32>
    %c0_33 = arith.constant 0 : index
    %c0_34 = arith.constant 0 : index
    %21 = vector.load %arg3[%c0_33, %c0_34] : memref<4x1xf32, #tpu.memory_space<vmem>>, vector<4x1xf32>
    %22 = vector.broadcast %21 : vector<4x1xf32> to vector<4x128xf32>
    %23 = arith.addf %20, %22 : vector<4x128xf32>
    %c0_35 = arith.constant 0 : index
    %c0_36 = arith.constant 0 : index
    %24 = vector.load %arg4[%c0_35, %c0_36] : memref<4x128xf32, #tpu.memory_space<vmem>>, vector<4x128xf32>
    tpu.vector_store %arg4[%c0_35, %c0_36], %23 {strides = array<i32>} : memref<4x128xf32, #tpu.memory_space<vmem>>, vector<4x128xf32>,
    return
  }
  func.func @transform_0(%arg0: i32) -> (i32, i32, i32, i32) {
    %c0_i32 = arith.constant 0 : i32
    %c0_i32_0 = arith.constant 0 : i32
    %c0_i32_1 = arith.constant 0 : i32
    %c0_i32_2 = arith.constant 0 : i32
    %c0_i32_3 = arith.constant 0 : i32
    return %c0_i32, %c0_i32_0, %c0_i32_1, %c0_i32_2 : i32, i32, i32, i32
  }
  func.func @transform_1(%arg0: i32) -> (i32, i32) {
    %c0_i32 = arith.constant 0 : i32
    %c0_i32_0 = arith.constant 0 : i32
    %c0_i32_1 = arith.constant 0 : i32
    return %c0_i32, %c0_i32_0 : i32, i32
  }
  func.func @transform_2(%arg0: i32) -> (i32, i32) {
    %c0_i32 = arith.constant 0 : i32
    %c0_i32_0 = arith.constant 0 : i32
    %c0_i32_1 = arith.constant 0 : i32
    return %c0_i32, %c0_i32_0 : i32, i32
  }
  func.func @transform_3(%arg0: i32) -> (i32, i32) {
    %c0_i32 = arith.constant 0 : i32
    %c0_i32_0 = arith.constant 0 : i32
    %c0_i32_1 = arith.constant 0 : i32
    return %c0_i32, %c0_i32_0 : i32, i32
  }
}

</mosaic_0001>

<bundles_post_ra>
// kernel: tpu_custom_call.1
= control target key start
LH: loop header
LB: loop body
LE: loop exit
PB: predicated region body
PF: predicated region fallthrough
CT: control target
= control target key end

     0   :  { %s1527_s28 = smov 4   ;;  %s1528_s29 = smov 12   ;;  %v1530_v17 = vmov 0.0|0.0   ;;  %s2171_s0 = inlined_call_operand.vmem [shape: f32[8,9,9,4], index: 0, kind: input, shape index: {}]   ;;  %s2172_s1 = inlined_call_operand.vmem [shape: f32[4,36], index: 1, kind: input, shape index: {}]   ;;  %s2173_s2 = inlined_call_operand.vmem [shape: f32[4,1], index: 2, kind: input, shape index: {}]   ;;  %s2174_s3 = inlined_call_operand.hbm [shape: f32[4,128], index: 3, kind: output, shape index: {}]  }
   0x1   :  { %v956_v0 = vld [vmem:[%s2171_s0 + $0x120] sm:$0xff]  ;;  %v957_v1 = vld [vmem:[%s2171_s0 + $0x130] sm:$0xff]  ;;  %s1529_s11 = smov 8   ;;  %1137 = vmatprep.subr.bf16.mxu0 %v1530_v17  ;;  %s1531_s12 = smov 16  }
   0x2   :  { %v972_v2 = vld [vmem:[%s2171_s0 + $0x240] sm:$0xff]  ;;  %v1182_v3 = vpack.i.bf16 %v957_v1, %v956_v0  ;;  %v973_v4 = vld [vmem:[%s2171_s0 + $0x250] sm:$0xff]  ;;  %s1532_s17 = smov 20   ;;  %s1533_s18 = smov 24  }
   0x3   :  { %v48_v5 = vld [vmem:[%s2171_s0 + $0x1] sm:$0xff]  ;;  %v49_v6 = vld [vmem:[%s2171_s0 + $0x11] sm:$0xff]  ;;  %v1192_v7 = vpack.i.bf16 %v973_v4, %v972_v2  ;;  %s1534_s23 = smov 28   ;;  %s1535_s24 = smov 32  }
   0x4   :  { %v988_v8 = vld [vmem:[%s2171_s0 + $0x360] sm:$0xff]  ;;  %v989_v9 = vld [vmem:[%s2171_s0 + $0x370] sm:$0xff]  ;;  %1183 = vrot.lane.b32.xlu0 %v1182_v3, %s1527_s28  ;;  %v1187_v10 = vpack.i.bf16 %v49_v6, %v48_v5 }
   0x5   :  { %1193 = vrot.lane.b32.xlu1 %v1192_v7, %s1528_s29  ;;  %v1197_v11 = vpack.i.bf16 %v989_v9, %v988_v8  ;;  %v1004_v12 = vld [vmem:[%s2171_s0 + $0x241] sm:$0xff]  ;;  %v1005_v13 = vld [vmem:[%s2171_s0 + $0x251] sm:$0xff] }
   0x6   :  { %v1595_v14 = vld [vmem:[%s2171_s0 + $0x10] sm:$0xff]  ;;  %v1600_v15 = vld [vmem:[%s2171_s0 + $0x20] sm:$0xff]  ;;  %v1202_v16 = vpack.i.bf16 %v1005_v13, %v1004_v12 }
   0x7   :  { %v1207_v18 = vpack.i.bf16 %v1600_v15, %v1595_v14  ;;  %v1037_v19 = vld [vmem:[%s2171_s0 + $0x140] sm:$0xff]  ;;  %v959_v23 = vld [vmem:[%s2171_s0 + $0x150] sm:$0xff] }
   0x8   :  { %1188 = vrot.lane.b32.xlu0 %v1187_v10, %s1529_s11  ;;  %v1053_v20 = vld [vmem:[%s2171_s0 + $0x21] sm:$0xff]  ;;  %v1212_v21 = vpack.i.bf16 %v1037_v19, %v957_v1  ;;  %v51_v24 = vld [vmem:[%s2171_s0 + $0x31] sm:$0xff]  ;;  %v1222_v25 = vpack.i.bf16 %v959_v23, %v1037_v19 }
   0x9   :  { %1198 = vrot.lane.b32.xlu1 %v1197_v11, %s1531_s12  ;;  %v1217_v22 = vpack.i.bf16 %v1053_v20, %v49_v6  ;;  %v1227_v26 = vpack.i.bf16 %v51_v24, %v1053_v20  ;;  %v974_v27 = vld [vmem:[%s2171_s0 + $0x260] sm:$0xff]  ;;  %v975_v28 = vld [vmem:[%s2171_s0 + $0x270] sm:$0xff] }
   0xa   :  { %v990_v29 = vld [vmem:[%s2171_s0 + $0x380] sm:$0xff]  ;;  %v991_v30 = vld [vmem:[%s2171_s0 + $0x390] sm:$0xff]  ;;  %v1232_v31 = vpack.i.bf16 %v975_v28, %v974_v27 }
   0xb   :  { %v1237_v32 = vpack.i.bf16 %v991_v30, %v990_v29  ;;  %v1006_v33 = vld [vmem:[%s2171_s0 + $0x261] sm:$0xff]  ;;  %v1007_v34 = vld [vmem:[%s2171_s0 + $0x271] sm:$0xff] }
   0xc   :  { %1203 = vrot.lane.b32.xlu0 %v1202_v16, %s1532_s17  ;;  %v1646_v35 = vld [vmem:[%s2171_s0 + $0x30] sm:$0xff]  ;;  %v1651_v36 = vld [vmem:[%s2171_s0 + $0x40] sm:$0xff]  ;;  %v1242_v37 = vpack.i.bf16 %v1007_v34, %v1006_v33 }
   0xd   :  { %1208 = vrot.lane.b32.xlu1 %v1207_v18, %s1533_s18  ;;  %v1247_v38 = vpack.i.bf16 %v1651_v36, %v1646_v35  ;;  %v1039_v39 = vld [vmem:[%s2171_s0 + $0x160] sm:$0xff]  ;;  %v961_v43 = vld [vmem:[%s2171_s0 + $0x170] sm:$0xff] }
   0xe   :  { %v1055_v40 = vld [vmem:[%s2171_s0 + $0x41] sm:$0xff]  ;;  %v1252_v41 = vpack.i.bf16 %v1039_v39, %v959_v23  ;;  %v53_v44 = vld [vmem:[%s2171_s0 + $0x51] sm:$0xff]  ;;  %v1262_v45 = vpack.i.bf16 %v961_v43, %v1039_v39 }
   0xf   :  { %v1257_v42 = vpack.i.bf16 %v1055_v40, %v51_v24  ;;  %v1267_v46 = vpack.i.bf16 %v53_v44, %v1055_v40  ;;  %v976_v47 = vld [vmem:[%s2171_s0 + $0x280] sm:$0xff]  ;;  %v977_v48 = vld [vmem:[%s2171_s0 + $0x290] sm:$0xff] }
  0x10   :  { %1213 = vrot.lane.b32.xlu0 %v1212_v21, %s1534_s23  ;;  %v992_v49 = vld [vmem:[%s2171_s0 + $0x3a0] sm:$0xff]  ;;  %v993_v50 = vld [vmem:[%s2171_s0 + $0x3b0] sm:$0xff] }
  0x11   :  { %1218 = vrot.lane.b32.xlu1 %v1217_v22, %s1535_s24 }
  0x14   :  { %1223 = vrot.lane.b32.xlu0 %v1222_v25, %s1527_s28 }
  0x15   :  { %1228 = vrot.lane.b32.xlu1 %v1227_v26, %s1529_s11 }
  0x18   :  { %1233 = vrot.lane.b32.xlu0 %v1232_v31, %s1528_s29 }
  0x19   :  { %1238 = vrot.lane.b32.xlu1 %v1237_v32, %s1531_s12 }
  0x1c   :  { %1243 = vrot.lane.b32.xlu0 %v1242_v37, %s1532_s17 }
  0x1d   :  { %1248 = vrot.lane.b32.xlu1 %v1247_v38, %s1533_s18 }
  0x20   :  { %1253 = vrot.lane.b32.xlu0 %v1252_v41, %s1534_s23 }
  0x21   :  { %1258 = vrot.lane.b32.xlu1 %v1257_v42, %s1535_s24 }
  0x22   :  { %8 = vsyncpa [#allocation3], 0  ;;  %v1272_v51 = vpack.i.bf16 %v977_v48, %v976_v47  ;;  %v1277_v52 = vpack.i.bf16 %v993_v50, %v992_v49  ;;  %v1008_v53 = vld [vmem:[%s2171_s0 + $0x281] sm:$0xff]  ;;  %v1009_v54 = vld [vmem:[%s2171_s0 + $0x291] sm:$0xff]  ;;  %vm676_vm0 = vcmask 31744   ;;  %vm693_vm1 = vcmask 64512  }
  0x23   :  { %v1696_v55 = vld [vmem:[%s2171_s0 + $0x50] sm:$0xff]  ;;  %v1701_v56 = vld [vmem:[%s2171_s0 + $0x60] sm:$0xff]  ;;  %v1282_v57 = vpack.i.bf16 %v1009_v54, %v1008_v53  ;;  %vm710_vm2 = vcmask 97280   ;;  %vm727_vm3 = vcmask 130048   ;;  %vm1536_vm4 = vmmov 0  }
  0x24   :  { %1263 = vrot.lane.b32.xlu0 %v1262_v45, %s1527_s28  ;;  %v1287_v58 = vpack.i.bf16 %v1701_v56, %v1696_v55  ;;  %v1041_v59 = vld [vmem:[%s2171_s0 + $0x180] sm:$0xff]  ;;  %v963_v63 = vld [vmem:[%s2171_s0 + $0x190] sm:$0xff]  ;;  %vm744_vm5 = vcmask 162816   ;;  %vm761_vm6 = vcmask 195584   ;;  %vm778_vm7 = vcmask 228352  }
  0x25   :  { %1268 = vrot.lane.b32.xlu1 %v1267_v46, %s1529_s11  ;;  %v1057_v60 = vld [vmem:[%s2171_s0 + $0x61] sm:$0xff]  ;;  %v1292_v61 = vpack.i.bf16 %v1041_v59, %v961_v43  ;;  %v55_v0 = vld [vmem:[%s2171_s0 + $0x71] sm:$0xff]  ;;  %v1302_v1 = vpack.i.bf16 %v963_v63, %v1041_v59  ;;  %vm795_vm8 = vcmask 261120   ;;  %vm819_vm9 = vcmask 293888  }
  0x26   :  { %v1297_v62 = vpack.i.bf16 %v1057_v60, %v53_v44  ;;  %v1307_v2 = vpack.i.bf16 %v55_v0, %v1057_v60  ;;  %v978_v3 = vld [vmem:[%s2171_s0 + $0x2a0] sm:$0xff]  ;;  %v979_v4 = vld [vmem:[%s2171_s0 + $0x2b0] sm:$0xff]  ;;  %vm2000_vm10 = vmpackc.low %vm819_vm9, %vm819_vm9 }
  0x27   :  { %v994_v5 = vld [vmem:[%s2171_s0 + $0x3c0] sm:$0xff]  ;;  %v995_v6 = vld [vmem:[%s2171_s0 + $0x3d0] sm:$0xff]  ;;  %v1312_v7 = vpack.i.bf16 %v979_v4, %v978_v3 }
  0x28   :  { %1273 = vrot.lane.b32.xlu0 %v1272_v51, %s1528_s29  ;;  %v1317_v8 = vpack.i.bf16 %v995_v6, %v994_v5  ;;  %v1010_v9 = vld [vmem:[%s2171_s0 + $0x2a1] sm:$0xff]  ;;  %v1011_v10 = vld [vmem:[%s2171_s0 + $0x2b1] sm:$0xff] }
  0x29   :  { %1278 = vrot.lane.b32.xlu1 %v1277_v52, %s1531_s12  ;;  %v1746_v11 = vld [vmem:[%s2171_s0 + $0x70] sm:$0xff]  ;;  %v1027_v12 = vld [vmem:[%s2171_s0 + $0x80] sm:$0xff]  ;;  %v1322_v13 = vpack.i.bf16 %v1011_v10, %v1010_v9 }
  0x2a   :  { %v1327_v16 = vpack.i.bf16 %v1027_v12, %v1746_v11  ;;  %v1043_v18 = vld [vmem:[%s2171_s0 + $0x1a0] sm:$0xff]  ;;  %v964_v22 = vld [vmem:[%s2171_s0 + $0x1b0] sm:$0xff] }
  0x2b   :  { %v1059_v19 = vld [vmem:[%s2171_s0 + $0x81] sm:$0xff]  ;;  %v1332_v20 = vpack.i.bf16 %v1043_v18, %v963_v63  ;;  %v56_v24 = vld [vmem:[%s2171_s0 + $0x91] sm:$0xff] }
  0x2c   :  { %1283 = vrot.lane.b32.xlu0 %v1282_v57, %s1532_s17  ;;  %v1337_v21 = vpack.i.bf16 %v1059_v19, %v55_v0  ;;  %v965_v23 = vld [vmem:[%s2171_s0 + $0x1c0] sm:$0xff]  ;;  %v980_v28 = vld [vmem:[%s2171_s0 + $0x2d0] sm:$0xff] }
  0x2d   :  { %1288 = vrot.lane.b32.xlu1 %v1287_v58, %s1533_s18  ;;  %v57_v25 = vld [vmem:[%s2171_s0 + $0xa1] sm:$0xff]  ;;  %v1342_v26 = vpack.i.bf16 %v965_v23, %v964_v22  ;;  %v996_v30 = vld [vmem:[%s2171_s0 + $0x3f0] sm:$0xff] }
  0x2e   :  { %v1347_v27 = vpack.i.bf16 %v57_v25, %v56_v24  ;;  %v981_v29 = vld [vmem:[%s2171_s0 + $0x2e0] sm:$0xff]  ;;  %v1012_v34 = vld [vmem:[%s2171_s0 + $0x2d1] sm:$0xff] }
  0x2f   :  { %v997_v31 = vld [vmem:[%s2171_s0 + $0x400] sm:$0xff]  ;;  %v1352_v32 = vpack.i.bf16 %v981_v29, %v980_v28  ;;  %v1804_v39 = vld [vmem:[%s2171_s0 + $0xb0] sm:$0xff] }
  0x30   :  { %1293 = vrot.lane.b32.xlu0 %v1292_v61, %s1534_s23  ;;  %v1357_v33 = vpack.i.bf16 %v997_v31, %v996_v30  ;;  %v1013_v37 = vld [vmem:[%s2171_s0 + $0x2e1] sm:$0xff]  ;;  %v1045_v42 = vld [vmem:[%s2171_s0 + $0x1d0] sm:$0xff] }
  0x31   :  { %1298 = vrot.lane.b32.xlu1 %v1297_v62, %s1535_s24  ;;  %v1799_v38 = vld [vmem:[%s2171_s0 + $0xa0] sm:$0xff]  ;;  %v1362_v40 = vpack.i.bf16 %v1013_v37, %v1012_v34  ;;  %v1061_v43 = vld [vmem:[%s2171_s0 + $0xb1] sm:$0xff]  ;;  %v1372_v44 = vpack.i.bf16 %v1045_v42, %v965_v23 }
  0x32   :  { %v1367_v41 = vpack.i.bf16 %v1804_v39, %v1799_v38  ;;  %v1377_v45 = vpack.i.bf16 %v1061_v43, %v57_v25  ;;  %v967_v46 = vld [vmem:[%s2171_s0 + $0x1e0] sm:$0xff]  ;;  %v982_v50 = vld [vmem:[%s2171_s0 + $0x2f0] sm:$0xff] }
  0x33   :  { %v59_v47 = vld [vmem:[%s2171_s0 + $0xc1] sm:$0xff]  ;;  %v1382_v48 = vpack.i.bf16 %v967_v46, %v1045_v42  ;;  %v998_v52 = vld [vmem:[%s2171_s0 + $0x410] sm:$0xff] }
  0x34   :  { %1303 = vrot.lane.b32.xlu0 %v1302_v1, %s1527_s28  ;;  %v1387_v49 = vpack.i.bf16 %v59_v47, %v1061_v43  ;;  %v983_v51 = vld [vmem:[%s2171_s0 + $0x300] sm:$0xff]  ;;  %v1014_v58 = vld [vmem:[%s2171_s0 + $0x2f1] sm:$0xff] }
  0x35   :  { %1308 = vrot.lane.b32.xlu1 %v1307_v2, %s1529_s11  ;;  %v999_v53 = vld [vmem:[%s2171_s0 + $0x420] sm:$0xff]  ;;  %v1392_v54 = vpack.i.bf16 %v983_v51, %v982_v50  ;;  %v1854_v61 = vld [vmem:[%s2171_s0 + $0xd0] sm:$0xff] }
  0x36   :  { %v1397_v57 = vpack.i.bf16 %v999_v53, %v998_v52  ;;  %v1015_v59 = vld [vmem:[%s2171_s0 + $0x301] sm:$0xff]  ;;  %v1047_v0 = vld [vmem:[%s2171_s0 + $0x1f0] sm:$0xff] }
  0x37   :  { %v1849_v60 = vld [vmem:[%s2171_s0 + $0xc0] sm:$0xff]  ;;  %v1402_v62 = vpack.i.bf16 %v1015_v59, %v1014_v58  ;;  %v1063_v1 = vld [vmem:[%s2171_s0 + $0xd1] sm:$0xff]  ;;  %v1412_v2 = vpack.i.bf16 %v1047_v0, %v967_v46  ;;  %v1537_v59 = vmov 0.0  }
  0x38   :  { %1313 = vrot.lane.b32.xlu0 %v1312_v7, %s1528_s29  ;;  %v1407_v63 = vpack.i.bf16 %v1854_v61, %v1849_v60  ;;  %v1417_v3 = vpack.i.bf16 %v1063_v1, %v59_v47  ;;  %v969_v4 = vld [vmem:[%s2171_s0 + $0x200] sm:$0xff]  ;;  %v1000_v10 = vld [vmem:[%s2171_s0 + $0x430] sm:$0xff]  ;;  %1134 = vmatprep.mubr.msk.f32.mxu0 %vm1536_vm4, %v1537_v59 }
  0x39   :  { %1318 = vrot.lane.b32.xlu1 %v1317_v8, %s1531_s12  ;;  %v61_v5 = vld [vmem:[%s2171_s0 + $0xe1] sm:$0xff]  ;;  %v1422_v6 = vpack.i.bf16 %v969_v4, %v1047_v0  ;;  %v984_v8 = vld [vmem:[%s2171_s0 + $0x310] sm:$0xff] }
  0x3a   :  { %v1427_v7 = vpack.i.bf16 %v61_v5, %v1063_v1  ;;  %v985_v9 = vld [vmem:[%s2171_s0 + $0x320] sm:$0xff]  ;;  %v1016_v18 = vld [vmem:[%s2171_s0 + $0x311] sm:$0xff] }
  0x3b   :  { %v1001_v12 = vld [vmem:[%s2171_s0 + $0x440] sm:$0xff]  ;;  %v1049_v24 = vld [vmem:[%s2171_s0 + $0x210] sm:$0xff] }
  0x3c   :  { %1323 = vrot.lane.b32.xlu0 %v1322_v13, %s1532_s17  ;;  %v1432_v13 = vpack.i.bf16 %v985_v9, %v984_v8  ;;  %v1017_v19 = vld [vmem:[%s2171_s0 + $0x321] sm:$0xff]  ;;  %v1065_v25 = vld [vmem:[%s2171_s0 + $0xf1] sm:$0xff] }
  0x3d   :  { %1328 = vrot.lane.b32.xlu1 %v1327_v16, %s1533_s18  ;;  %v1437_v16 = vpack.i.bf16 %v1001_v12, %v1000_v10  ;;  %v1442_v22 = vpack.i.bf16 %v1017_v19, %v1016_v18  ;;  %v1921_v28 = vld [vmem:[%s2171_s0 + $0x220] sm:$0xff]  ;;  %v1002_v34 = vld [vmem:[%s2171_s0 + $0x450] sm:$0xff] }
  0x3e   :  { %v1926_v29 = vld [vmem:[%s2171_s0 + $0x101] sm:$0xff]  ;;  %v1462_v30 = vpack.i.bf16 %v1921_v28, %v1049_v24  ;;  %v1018_v42 = vld [vmem:[%s2171_s0 + $0x331] sm:$0xff] }
  0x3f   :  { %v1467_v31 = vpack.i.bf16 %v1926_v29, %v1065_v25  ;;  %v1003_v37 = vld [vmem:[%s2171_s0 + $0x460] sm:$0xff]  ;;  %v1035_v46 = vld [vmem:[%s2171_s0 + $0x110] sm:$0xff] }
  0x40   :  { %1333 = vrot.lane.b32.xlu0 %v1332_v20, %s1534_s23  ;;  %v1899_v20 = vld [vmem:[%s2171_s0 + $0xe0] sm:$0xff]  ;;  %v1067_v58 = vld [vmem:[%s2171_s0 + $0x111] sm:$0xff] }
  0x41   :  { %1338 = vrot.lane.b32.xlu1 %v1337_v21, %s1535_s24  ;;  %v1904_v21 = vld [vmem:[%s2171_s0 + $0xf0] sm:$0xff]  ;;  %v1019_v43 = vld [vmem:[%s2171_s0 + $0x341] sm:$0xff]  ;;  %v1497_v9 = vpack.i.bf16 %v1067_v58, %v1926_v29 }
  0x42   :  { %v1447_v23 = vpack.i.bf16 %v1904_v21, %v1899_v20  ;;  %v1482_v51 = vpack.i.bf16 %v1019_v43, %v1018_v42  ;;  %v15_v52 = vld [vmem:[%s2171_s0] sm:$0xff] }
  0x44   :  { %1343 = vrot.lane.b32.xlu0 %v1342_v26, %s1527_s28  ;;  %v1452_v26 = vpack.i.bf16 %v1049_v24, %v969_v4 }
  0x45   :  { %1348 = vrot.lane.b32.xlu1 %v1347_v27, %s1529_s11  ;;  %v1457_v27 = vpack.i.bf16 %v1065_v25, %v61_v5 }
  0x48   :  { %1353 = vrot.lane.b32.xlu0 %v1352_v32, %s1528_s29  ;;  %v986_v32 = vld [vmem:[%s2171_s0 + $0x330] sm:$0xff] }
  0x49   :  { %1358 = vrot.lane.b32.xlu1 %v1357_v33, %s1531_s12  ;;  %v987_v33 = vld [vmem:[%s2171_s0 + $0x340] sm:$0xff] }
  0x4c   :  { %1363 = vrot.lane.b32.xlu0 %v1362_v40, %s1532_s17  ;;  %v1472_v40 = vpack.i.bf16 %v987_v33, %v986_v32 }
  0x4d   :  { %1368 = vrot.lane.b32.xlu1 %v1367_v41, %s1533_s18  ;;  %v1477_v41 = vpack.i.bf16 %v1003_v37, %v1002_v34 }
  0x50   :  { %1373 = vrot.lane.b32.xlu0 %v1372_v44, %s1534_s23 }
  0x51   :  { %1378 = vrot.lane.b32.xlu1 %v1377_v45, %s1535_s24  ;;  %v1955_v45 = vld [vmem:[%s2171_s0 + $0x100] sm:$0xff] }
  0x52   :  { %v1487_v53 = vpack.i.bf16 %v1035_v46, %v1955_v45 }
  0x54   :  { %1383 = vrot.lane.b32.xlu0 %v1382_v48, %s1527_s28  ;;  %v1051_v48 = vld [vmem:[%s2171_s0 + $0x230] sm:$0xff] }
  0x55   :  { %1388 = vrot.lane.b32.xlu1 %v1387_v49, %s1529_s11 }
  0x58   :  { %1393 = vrot.lane.b32.xlu0 %v1392_v54, %s1528_s29 }
  0x59   :  { %1398 = vrot.lane.b32.xlu1 %v1397_v57, %s1531_s12  ;;  %v1492_v57 = vpack.i.bf16 %v1051_v48, %v1921_v28  ;;  %v813_v28 = vld [vmem:[%s2173_s2] sm:$0xf] }
  0x5c   :  { %1403 = vrot.lane.b32.xlu0 %v1402_v62, %s1532_s17 }
  0x5d   :  { %1408 = vrot.lane.b32.xlu1 %v1407_v63, %s1533_s18 }
  0x60   :  { %1413 = vrot.lane.b32.xlu0 %v1412_v2, %s1534_s23 }
  0x61   :  { %1418 = vrot.lane.b32.xlu1 %v1417_v3, %s1535_s24 }
  0x64   :  { %1423 = vrot.lane.b32.xlu0 %v1422_v6, %s1527_s28 }
  0x65   :  { %1428 = vrot.lane.b32.xlu1 %v1427_v7, %s1529_s11 }
  0x68   :  { %1433 = vrot.lane.b32.xlu0 %v1432_v13, %s1528_s29 }
  0x69   :  { %1438 = vrot.lane.b32.xlu1 %v1437_v16, %s1531_s12 }
  0x6c   :  { %1443 = vrot.lane.b32.xlu0 %v1442_v22, %s1532_s17 }
  0x6d   :  { %1448 = vrot.lane.b32.xlu1 %v1447_v23, %s1533_s18 }
  0x70   :  { %1453 = vrot.lane.b32.xlu0 %v1452_v26, %s1534_s23 }
  0x71   :  { %1458 = vrot.lane.b32.xlu1 %v1457_v27, %s1535_s24  ;;  %v1538_v27 = vmov 0  }
  0x72   :  { %1502 = vset.pattern.permute.xlu0 %v1538_v27 }
  0x74   :  { %1463 = vrot.lane.b32.xlu0 %v1462_v30, %s1527_s28 }
  0x75   :  { %1468 = vrot.lane.b32.xlu1 %v1467_v31, %s1529_s11 }
  0x76   :  { %v1184_v44 = vpop.permute.xlu0 %1183 }
  0x77   :  { %v1194_v47 = vpop.permute.xlu1 %1193  ;;  %v1186_v49 = vunpack.i.h.bf16 %v1184_v44  ;;  %v1185_v50 = vunpack.i.l.bf16 %v1184_v44 }
  0x78   :  { %1473 = vrot.lane.b32.xlu0 %v1472_v40, %s1528_s29  ;;  %v1196_v62 = vunpack.i.h.bf16 %v1194_v47  ;;  %v1195_v63 = vunpack.i.l.bf16 %v1194_v47 }
  0x79   :  { %1478 = vrot.lane.b32.xlu1 %v1477_v41, %s1531_s12  ;;  %v677_v3 = vsel %vm676_vm0, %v15_v52, %v1185_v50  ;;  %v678_v4 = vsel %vm676_vm0, %v1595_v14, %v1186_v49 }
  0x7a   :  { %v1189_v54 = vpop.permute.xlu0 %1188 }
  0x7b   :  { %v1191_v0 = vunpack.i.h.bf16 %v1189_v54  ;;  %v1190_v1 = vunpack.i.l.bf16 %v1189_v54  ;;  %v1199_v2 = vpop.permute.xlu1 %1198 }
  0x7c   :  { %v1201_v5 = vunpack.i.h.bf16 %v1199_v2  ;;  %v1200_v6 = vunpack.i.l.bf16 %v1199_v2  ;;  %1483 = vrot.lane.b32.xlu0 %v1482_v51, %s1532_s17 }
  0x7d   :  { %v694_v7 = vsel %vm693_vm1, %v677_v3, %v1190_v1  ;;  %v695_v8 = vsel %vm693_vm1, %v678_v4, %v1191_v0  ;;  %1488 = vrot.lane.b32.xlu1 %v1487_v53, %s1533_s18 }
  0x7e   :  { %v711_v10 = vsel %vm710_vm2, %v694_v7, %v1195_v63  ;;  %v712_v12 = vsel %vm710_vm2, %v695_v8, %v1196_v62  ;;  %v1204_v13 = vpop.permute.xlu0 %1203 }
  0x7f   :  { %v728_v14 = vsel %vm727_vm3, %v711_v10, %v1200_v6  ;;  %v729_v16 = vsel %vm727_vm3, %v712_v12, %v1201_v5  ;;  %v1206_v18 = vunpack.i.h.bf16 %v1204_v13  ;;  %v1205_v19 = vunpack.i.l.bf16 %v1204_v13  ;;  %v1209_v22 = vpop.permute.xlu1 %1208 }
  0x80   :  { %v1211_v23 = vunpack.i.h.bf16 %v1209_v22  ;;  %v1210_v24 = vunpack.i.l.bf16 %v1209_v22  ;;  %1493 = vrot.lane.b32.xlu0 %v1492_v57, %s1534_s23  ;;  %s1539_s23 = smov [#allocation2]  }
  0x81   :  { %v745_v25 = vsel %vm744_vm5, %v728_v14, %v1205_v19  ;;  %v746_v26 = vsel %vm744_vm5, %v729_v16, %v1206_v18  ;;  %1498 = vrot.lane.b32.xlu1 %v1497_v9, %s1535_s24  ;;  %s948_s24 = sshll.u32 %s1539_s23, 4  ;;  %s949_s24 = int_to_ptr.vmem [resolvable:$true] %s948_s24 }
  0x82   :  { %v1214_v29 = vpop.permute.xlu0 %1213  ;;  %v762_v33 = vsel %vm761_vm6, %v745_v25, %v1210_v24  ;;  %v763_v34 = vsel %vm761_vm6, %v746_v26, %v1211_v23  ;;  %s1503_s20 = scalar_lea.vmem %s949_s24, 64  ;;  %p1508_p1 = scmp.lt.s32.totalorder %s949_s24, %s949_s24 }
  0x83   :  { %v1216_v30 = vunpack.i.h.bf16 %v1214_v29  ;;  %v1215_v31 = vunpack.i.l.bf16 %v1214_v29  ;;  %v1219_v32 = vpop.permute.xlu1 %1218  ;;  %p1504_p0 = scmp.ne.s32.totalorder %s949_s24, %s1503_s20  ;;  %p1509_p2 = scmp.lt.s32.totalorder %s1503_s20, %s1503_s20 }
  0x84   :  { %v1221_v37 = vunpack.i.h.bf16 %v1219_v32  ;;  %v1220_v40 = vunpack.i.l.bf16 %v1219_v32  ;;  %816 = vperm.xlu0 %1502, %v813_v28  }
  0x85   :  { %v779_v41 = vsel %vm778_vm7, %v762_v33, %v1215_v31  ;;  %v780_v42 = vsel %vm778_vm7, %v763_v34, %v1216_v30  ;;  %p1510_p3 = por %p1509_p2, %p1508_p1 }
  0x86   :  { %v1224_v43 = vpop.permute.xlu0 %1223  ;;  %v796_v44 = vsel %vm795_vm8, %v779_v41, %v1220_v40  ;;  %v797_v46 = vsel %vm795_vm8, %v780_v42, %v1221_v37 }
  0x87   :  { %v1226_v48 = vunpack.i.h.bf16 %v1224_v43  ;;  %v1225_v49 = vunpack.i.l.bf16 %v1224_v43  ;;  %v1229_v50 = vpop.permute.xlu1 %1228  ;;  %v1138_v51 = vpack.c.bf16 %v797_v46, %v796_v44  ;;  %p1511_p4 = pnand %p1510_p3, %p1504_p0 }
  0x88   :  { %v1231_v52 = vunpack.i.h.bf16 %v1229_v50  ;;  %v1230_v53 = vunpack.i.l.bf16 %v1229_v50 }
  0x89   :  { %v679_v54 = vsel %vm676_vm0, %v1600_v15, %v1225_v49  ;;  %v680_v57 = vsel %vm676_vm0, %v1646_v35, %v1226_v48  ;;  %1140 = vmatpush3.bf16.xpose.msk.msra.mxu0 %vm2000_vm10, %v1138_v51 }
  0x8a   :  { %v1234_v58 = vpop.permute.xlu0 %1233  ;;  %1141 = vmatprep.subr.bf16.mxu0 %v1530_v17  ;;  %v696_v0 = vsel %vm693_vm1, %v679_v54, %v1230_v53  ;;  %v697_v1 = vsel %vm693_vm1, %v680_v57, %v1231_v52 }
  0x8b   :  { %v1236_v59 = vunpack.i.h.bf16 %v1234_v58  ;;  %v1235_v62 = vunpack.i.l.bf16 %v1234_v58  ;;  %v1239_v63 = vpop.permute.xlu1 %1238 }
  0x8c   :  { %v1241_v2 = vunpack.i.h.bf16 %v1239_v63  ;;  %v1240_v3 = vunpack.i.l.bf16 %v1239_v63 }
  0x8d   :  { %v713_v15 = vsel %vm710_vm2, %v696_v0, %v1235_v62  ;;  %v714_v4 = vsel %vm710_vm2, %v697_v1, %v1236_v59 }
  0x8e   :  { %v1244_v35 = vpop.permute.xlu0 %1243  ;;  %v730_v8 = vsel %vm727_vm3, %v713_v15, %v1240_v3  ;;  %v731_v9 = vsel %vm727_vm3, %v714_v4, %v1241_v2 }
  0x8f   :  { %v1246_v5 = vunpack.i.h.bf16 %v1244_v35  ;;  %v1245_v6 = vunpack.i.l.bf16 %v1244_v35  ;;  %v1249_v7 = vpop.permute.xlu1 %1248 }
  0x90   :  { %v1251_v10 = vunpack.i.h.bf16 %v1249_v7  ;;  %v1250_v12 = vunpack.i.l.bf16 %v1249_v7 }
  0x91   :  { %v747_v13 = vsel %vm744_vm5, %v730_v8, %v1245_v6  ;;  %v748_v14 = vsel %vm744_vm5, %v731_v9, %v1246_v5 }
  0x92   :  { %v1254_v16 = vpop.permute.xlu0 %1253  ;;  %v764_v23 = vsel %vm761_vm6, %v747_v13, %v1250_v12  ;;  %v765_v24 = vsel %vm761_vm6, %v748_v14, %v1251_v10 }
  0x93   :  { %v1256_v18 = vunpack.i.h.bf16 %v1254_v16  ;;  %v1255_v19 = vunpack.i.l.bf16 %v1254_v16  ;;  %v1259_v22 = vpop.permute.xlu1 %1258 }
  0x94   :  { %v1261_v25 = vunpack.i.h.bf16 %v1259_v22  ;;  %v1260_v26 = vunpack.i.l.bf16 %v1259_v22 }
  0x95   :  { %v781_v27 = vsel %vm778_vm7, %v764_v23, %v1255_v19  ;;  %v782_v28 = vsel %vm778_vm7, %v765_v24, %v1256_v18 }
  0x96   :  { %v798_v29 = vsel %vm795_vm8, %v781_v27, %v1260_v26  ;;  %v799_v30 = vsel %vm795_vm8, %v782_v28, %v1261_v25  ;;  %v1264_v31 = vpop.permute.xlu0 %1263 }
  0x97   :  { %v1142_v32 = vpack.c.bf16 %v799_v30, %v798_v29  ;;  %v1266_v33 = vunpack.i.h.bf16 %v1264_v31  ;;  %v1265_v34 = vunpack.i.l.bf16 %v1264_v31  ;;  %v1269_v37 = vpop.permute.xlu1 %1268 }
  0x98   :  { %v1271_v40 = vunpack.i.h.bf16 %v1269_v37  ;;  %v1270_v41 = vunpack.i.l.bf16 %v1269_v37 }
  0x99   :  { %v681_v42 = vsel %vm676_vm0, %v1651_v36, %v1265_v34  ;;  %v682_v43 = vsel %vm676_vm0, %v1696_v55, %v1266_v33  ;;  %1144 = vmatpush3.bf16.xpose.msk.msra.mxu0 %vm2000_vm10, %v1142_v32 }
  0x9a   :  { %v1274_v44 = vpop.permute.xlu0 %1273  ;;  %1145 = vmatprep.subr.bf16.mxu0 %v1530_v17  ;;  %v698_v50 = vsel %vm693_vm1, %v681_v42, %v1270_v41  ;;  %v699_v51 = vsel %vm693_vm1, %v682_v43, %v1271_v40 }
  0x9b   :  { %v1276_v46 = vunpack.i.h.bf16 %v1274_v44  ;;  %v1275_v48 = vunpack.i.l.bf16 %v1274_v44  ;;  %v1279_v49 = vpop.permute.xlu1 %1278 }
  0x9c   :  { %v1281_v52 = vunpack.i.h.bf16 %v1279_v49  ;;  %v1280_v53 = vunpack.i.l.bf16 %v1279_v49 }
  0x9d   :  { %v715_v36 = vsel %vm710_vm2, %v698_v50, %v1275_v48  ;;  %v716_v54 = vsel %vm710_vm2, %v699_v51, %v1276_v46 }
  0x9e   :  { %v1284_v55 = vpop.permute.xlu0 %1283  ;;  %v732_v62 = vsel %vm727_vm3, %v715_v36, %v1280_v53  ;;  %v733_v63 = vsel %vm727_vm3, %v716_v54, %v1281_v52 }
  0x9f   :  { %v1286_v57 = vunpack.i.h.bf16 %v1284_v55  ;;  %v1285_v58 = vunpack.i.l.bf16 %v1284_v55  ;;  %v1289_v59 = vpop.permute.xlu1 %1288 }
  0xa0   :  { %v1291_v0 = vunpack.i.h.bf16 %v1289_v59  ;;  %v1290_v1 = vunpack.i.l.bf16 %v1289_v59 }
  0xa1   :  { %v749_v2 = vsel %vm744_vm5, %v732_v62, %v1285_v58  ;;  %v750_v3 = vsel %vm744_vm5, %v733_v63, %v1286_v57 }
  0xa2   :  { %v1294_v15 = vpop.permute.xlu0 %1293  ;;  %v766_v6 = vsel %vm761_vm6, %v749_v2, %v1290_v1  ;;  %v767_v7 = vsel %vm761_vm6, %v750_v3, %v1291_v0  ;;  %v23_v3 = vld [vmem:[%s2171_s0 + $0x90] sm:$0xff] }
  0xa3   :  { %v1296_v4 = vunpack.i.h.bf16 %v1294_v15  ;;  %v1295_v35 = vunpack.i.l.bf16 %v1294_v15  ;;  %v1299_v5 = vpop.permute.xlu1 %1298 }
  0xa4   :  { %v1301_v8 = vunpack.i.h.bf16 %v1299_v5  ;;  %v1300_v9 = vunpack.i.l.bf16 %v1299_v5 }
  0xa5   :  { %v783_v10 = vsel %vm778_vm7, %v766_v6, %v1295_v35  ;;  %v784_v12 = vsel %vm778_vm7, %v767_v7, %v1296_v4 }
  0xa6   :  { %v800_v13 = vsel %vm795_vm8, %v783_v10, %v1300_v9  ;;  %v801_v14 = vsel %vm795_vm8, %v784_v12, %v1301_v8  ;;  %v1304_v16 = vpop.permute.xlu0 %1303 }
  0xa7   :  { %v1146_v18 = vpack.c.bf16 %v801_v14, %v800_v13  ;;  %v1306_v19 = vunpack.i.h.bf16 %v1304_v16  ;;  %v1305_v22 = vunpack.i.l.bf16 %v1304_v16  ;;  %v1309_v23 = vpop.permute.xlu1 %1308 }
  0xa8   :  { %v1311_v24 = vunpack.i.h.bf16 %v1309_v23  ;;  %v1310_v25 = vunpack.i.l.bf16 %v1309_v23 }
  0xa9   :  { %v683_v26 = vsel %vm676_vm0, %v1701_v56, %v1305_v22  ;;  %v684_v27 = vsel %vm676_vm0, %v1746_v11, %v1306_v19  ;;  %1148 = vmatpush3.bf16.xpose.msk.msra.mxu0 %vm2000_vm10, %v1146_v18 }
  0xaa   :  { %v1314_v28 = vpop.permute.xlu0 %1313  ;;  %1149 = vmatprep.subr.bf16.mxu0 %v1530_v17  ;;  %v700_v32 = vsel %vm693_vm1, %v683_v26, %v1310_v25  ;;  %v701_v33 = vsel %vm693_vm1, %v684_v27, %v1311_v24 }
  0xab   :  { %v1316_v29 = vunpack.i.h.bf16 %v1314_v28  ;;  %v1315_v30 = vunpack.i.l.bf16 %v1314_v28  ;;  %v1319_v31 = vpop.permute.xlu1 %1318 }
  0xac   :  { %v1321_v34 = vunpack.i.h.bf16 %v1319_v31  ;;  %v1320_v37 = vunpack.i.l.bf16 %v1319_v31 }
  0xad   :  { %v717_v56 = vsel %vm710_vm2, %v700_v32, %v1315_v30  ;;  %v718_v40 = vsel %vm710_vm2, %v701_v33, %v1316_v29 }
  0xae   :  { %v1324_v11 = vpop.permute.xlu0 %1323  ;;  %v734_v44 = vsel %vm727_vm3, %v717_v56, %v1320_v37  ;;  %v735_v46 = vsel %vm727_vm3, %v718_v40, %v1321_v34 }
  0xaf   :  { %v1326_v41 = vunpack.i.h.bf16 %v1324_v11  ;;  %v1325_v42 = vunpack.i.l.bf16 %v1324_v11  ;;  %v1329_v43 = vpop.permute.xlu1 %1328 }
  0xb0   :  { %v1331_v48 = vunpack.i.h.bf16 %v1329_v43  ;;  %v1330_v49 = vunpack.i.l.bf16 %v1329_v43 }
  0xb1   :  { %v751_v50 = vsel %vm744_vm5, %v734_v44, %v1325_v42  ;;  %v752_v51 = vsel %vm744_vm5, %v735_v46, %v1326_v41 }
  0xb2   :  { %v1334_v52 = vpop.permute.xlu0 %1333  ;;  %v768_v55 = vsel %vm761_vm6, %v751_v50, %v1330_v49  ;;  %v769_v57 = vsel %vm761_vm6, %v752_v51, %v1331_v48 }
  0xb3   :  { %v1336_v53 = vunpack.i.h.bf16 %v1334_v52  ;;  %v1335_v36 = vunpack.i.l.bf16 %v1334_v52  ;;  %v1339_v54 = vpop.permute.xlu1 %1338 }
  0xb4   :  { %v1341_v58 = vunpack.i.h.bf16 %v1339_v54  ;;  %v1340_v59 = vunpack.i.l.bf16 %v1339_v54 }
  0xb5   :  { %v785_v62 = vsel %vm778_vm7, %v768_v55, %v1335_v36  ;;  %v786_v63 = vsel %vm778_vm7, %v769_v57, %v1336_v53 }
  0xb6   :  { %v802_v0 = vsel %vm795_vm8, %v785_v62, %v1340_v59  ;;  %v803_v1 = vsel %vm795_vm8, %v786_v63, %v1341_v58  ;;  %v1344_v2 = vpop.permute.xlu0 %1343 }
  0xb7   :  { %v1150_v15 = vpack.c.bf16 %v803_v1, %v802_v0  ;;  %v1346_v4 = vunpack.i.h.bf16 %v1344_v2  ;;  %v1345_v35 = vunpack.i.l.bf16 %v1344_v2  ;;  %v1349_v5 = vpop.permute.xlu1 %1348 }
  0xb8   :  { %v1351_v6 = vunpack.i.h.bf16 %v1349_v5  ;;  %v1350_v7 = vunpack.i.l.bf16 %v1349_v5 }
  0xb9   :  { %v685_v8 = vsel %vm676_vm0, %v23_v3, %v1345_v35  ;;  %v686_v9 = vsel %vm676_vm0, %v1799_v38, %v1346_v4  ;;  %1152 = vmatpush3.bf16.xpose.msk.msra.mxu0 %vm2000_vm10, %v1150_v15 }
  0xba   :  { %v1354_v10 = vpop.permute.xlu0 %1353  ;;  %1153 = vmatprep.subr.bf16.mxu0 %v1530_v17  ;;  %v702_v16 = vsel %vm693_vm1, %v685_v8, %v1350_v7  ;;  %v703_v18 = vsel %vm693_vm1, %v686_v9, %v1351_v6 }
  0xbb   :  { %v1356_v12 = vunpack.i.h.bf16 %v1354_v10  ;;  %v1355_v13 = vunpack.i.l.bf16 %v1354_v10  ;;  %v1359_v14 = vpop.permute.xlu1 %1358 }
  0xbc   :  { %v1361_v19 = vunpack.i.h.bf16 %v1359_v14  ;;  %v1360_v22 = vunpack.i.l.bf16 %v1359_v14 }
  0xbd   :  { %v719_v23 = vsel %vm710_vm2, %v702_v16, %v1355_v13  ;;  %v720_v24 = vsel %vm710_vm2, %v703_v18, %v1356_v12 }
  0xbe   :  { %v1364_v38 = vpop.permute.xlu0 %1363  ;;  %v736_v28 = vsel %vm727_vm3, %v719_v23, %v1360_v22  ;;  %v737_v29 = vsel %vm727_vm3, %v720_v24, %v1361_v19 }
  0xbf   :  { %v1366_v25 = vunpack.i.h.bf16 %v1364_v38  ;;  %v1365_v26 = vunpack.i.l.bf16 %v1364_v38  ;;  %v1369_v27 = vpop.permute.xlu1 %1368 }
  0xc0   :  { %v1371_v30 = vunpack.i.h.bf16 %v1369_v27  ;;  %v1370_v31 = vunpack.i.l.bf16 %v1369_v27 }
  0xc1   :  { %v753_v32 = vsel %vm744_vm5, %v736_v28, %v1365_v26  ;;  %v754_v33 = vsel %vm744_vm5, %v737_v29, %v1366_v25 }
  0xc2   :  { %v1374_v34 = vpop.permute.xlu0 %1373  ;;  %v770_v11 = vsel %vm761_vm6, %v753_v32, %v1370_v31  ;;  %v771_v41 = vsel %vm761_vm6, %v754_v33, %v1371_v30 }
  0xc3   :  { %v1376_v37 = vunpack.i.h.bf16 %v1374_v34  ;;  %v1375_v56 = vunpack.i.l.bf16 %v1374_v34  ;;  %v1379_v40 = vpop.permute.xlu1 %1378 }
  0xc4   :  { %v1381_v42 = vunpack.i.h.bf16 %v1379_v40  ;;  %v1380_v43 = vunpack.i.l.bf16 %v1379_v40 }
  0xc5   :  { %v787_v44 = vsel %vm778_vm7, %v770_v11, %v1375_v56  ;;  %v788_v46 = vsel %vm778_vm7, %v771_v41, %v1376_v37 }
  0xc6   :  { %v804_v48 = vsel %vm795_vm8, %v787_v44, %v1380_v43  ;;  %v805_v49 = vsel %vm795_vm8, %v788_v46, %v1381_v42  ;;  %v1384_v50 = vpop.permute.xlu0 %1383 }
  0xc7   :  { %v1154_v51 = vpack.c.bf16 %v805_v49, %v804_v48  ;;  %v1386_v52 = vunpack.i.h.bf16 %v1384_v50  ;;  %v1385_v53 = vunpack.i.l.bf16 %v1384_v50  ;;  %v1389_v36 = vpop.permute.xlu1 %1388 }
  0xc8   :  { %v1391_v54 = vunpack.i.h.bf16 %v1389_v36  ;;  %v1390_v55 = vunpack.i.l.bf16 %v1389_v36 }
  0xc9   :  { %v687_v57 = vsel %vm676_vm0, %v1804_v39, %v1385_v53  ;;  %v688_v58 = vsel %vm676_vm0, %v1849_v60, %v1386_v52  ;;  %1156 = vmatpush3.bf16.xpose.msk.msra.mxu0 %vm2000_vm10, %v1154_v51 }
  0xca   :  { %v1394_v59 = vpop.permute.xlu0 %1393  ;;  %1157 = vmatprep.subr.bf16.mxu0 %v1530_v17  ;;  %v704_v1 = vsel %vm693_vm1, %v687_v57, %v1390_v55  ;;  %v705_v2 = vsel %vm693_vm1, %v688_v58, %v1391_v54 }
  0xcb   :  { %v1396_v62 = vunpack.i.h.bf16 %v1394_v59  ;;  %v1395_v63 = vunpack.i.l.bf16 %v1394_v59  ;;  %v1399_v0 = vpop.permute.xlu1 %1398 }
  0xcc   :  { %v1401_v3 = vunpack.i.h.bf16 %v1399_v0  ;;  %v1400_v15 = vunpack.i.l.bf16 %v1399_v0 }
  0xcd   :  { %v721_v39 = vsel %vm710_vm2, %v704_v1, %v1395_v63  ;;  %v722_v4 = vsel %vm710_vm2, %v705_v2, %v1396_v62 }
  0xce   :  { %v1404_v60 = vpop.permute.xlu0 %1403  ;;  %v738_v7 = vsel %vm727_vm3, %v721_v39, %v1400_v15  ;;  %v739_v8 = vsel %vm727_vm3, %v722_v4, %v1401_v3 }
  0xcf   :  { %v1406_v35 = vunpack.i.h.bf16 %v1404_v60  ;;  %v1405_v5 = vunpack.i.l.bf16 %v1404_v60  ;;  %v1409_v6 = vpop.permute.xlu1 %1408 }
  0xd0   :  { %v1411_v9 = vunpack.i.h.bf16 %v1409_v6  ;;  %v1410_v10 = vunpack.i.l.bf16 %v1409_v6 }
  0xd1   :  { %v755_v12 = vsel %vm744_vm5, %v738_v7, %v1405_v5  ;;  %v756_v13 = vsel %vm744_vm5, %v739_v8, %v1406_v35 }
  0xd2   :  { %v1414_v14 = vpop.permute.xlu0 %1413  ;;  %v772_v22 = vsel %vm761_vm6, %v755_v12, %v1410_v10  ;;  %v773_v23 = vsel %vm761_vm6, %v756_v13, %v1411_v9 }
  0xd3   :  { %v1416_v16 = vunpack.i.h.bf16 %v1414_v14  ;;  %v1415_v18 = vunpack.i.l.bf16 %v1414_v14  ;;  %v1419_v19 = vpop.permute.xlu1 %1418 }
  0xd4   :  { %v1421_v24 = vunpack.i.h.bf16 %v1419_v19  ;;  %v1420_v38 = vunpack.i.l.bf16 %v1419_v19 }
  0xd5   :  { %v789_v25 = vsel %vm778_vm7, %v772_v22, %v1415_v18  ;;  %v790_v26 = vsel %vm778_vm7, %v773_v23, %v1416_v16 }
  0xd6   :  { %v806_v27 = vsel %vm795_vm8, %v789_v25, %v1420_v38  ;;  %v807_v28 = vsel %vm795_vm8, %v790_v26, %v1421_v24  ;;  %v1424_v29 = vpop.permute.xlu0 %1423 }
  0xd7   :  { %v1158_v30 = vpack.c.bf16 %v807_v28, %v806_v27  ;;  %v1426_v31 = vunpack.i.h.bf16 %v1424_v29  ;;  %v1425_v32 = vunpack.i.l.bf16 %v1424_v29  ;;  %v1429_v33 = vpop.permute.xlu1 %1428 }
  0xd8   :  { %v1431_v34 = vunpack.i.h.bf16 %v1429_v33  ;;  %v1430_v37 = vunpack.i.l.bf16 %v1429_v33 }
  0xd9   :  { %v689_v56 = vsel %vm676_vm0, %v1854_v61, %v1425_v32  ;;  %v690_v40 = vsel %vm676_vm0, %v1899_v20, %v1426_v31  ;;  %1160 = vmatpush3.bf16.xpose.msk.msra.mxu0 %vm2000_vm10, %v1158_v30 }
  0xda   :  { %v1434_v11 = vpop.permute.xlu0 %1433  ;;  %1161 = vmatprep.subr.bf16.mxu0 %v1530_v17  ;;  %v706_v44 = vsel %vm693_vm1, %v689_v56, %v1430_v37  ;;  %v707_v46 = vsel %vm693_vm1, %v690_v40, %v1431_v34 }
  0xdb   :  { %v1436_v41 = vunpack.i.h.bf16 %v1434_v11  ;;  %v1435_v42 = vunpack.i.l.bf16 %v1434_v11  ;;  %v1439_v43 = vpop.permute.xlu1 %1438 }
  0xdc   :  { %v1441_v48 = vunpack.i.h.bf16 %v1439_v43  ;;  %v1440_v49 = vunpack.i.l.bf16 %v1439_v43 }
  0xdd   :  { %v723_v61 = vsel %vm710_vm2, %v706_v44, %v1435_v42  ;;  %v724_v50 = vsel %vm710_vm2, %v707_v46, %v1436_v41 }
  0xde   :  { %v1444_v20 = vpop.permute.xlu0 %1443  ;;  %v740_v36 = vsel %vm727_vm3, %v723_v61, %v1440_v49  ;;  %v741_v54 = vsel %vm727_vm3, %v724_v50, %v1441_v48 }
  0xdf   :  { %v1446_v51 = vunpack.i.h.bf16 %v1444_v20  ;;  %v1445_v52 = vunpack.i.l.bf16 %v1444_v20  ;;  %v1449_v53 = vpop.permute.xlu1 %1448 }
  0xe0   :  { %v1451_v55 = vunpack.i.h.bf16 %v1449_v53  ;;  %v1450_v57 = vunpack.i.l.bf16 %v1449_v53 }
  0xe1   :  { %v757_v58 = vsel %vm744_vm5, %v740_v36, %v1445_v52  ;;  %v758_v59 = vsel %vm744_vm5, %v741_v54, %v1446_v51  ;;  %v812_v51 = vld [vmem:[%s2172_s1] sm:$0xf] }
  0xe2   :  { %v1454_v62 = vpop.permute.xlu0 %1453  ;;  %v774_v2 = vsel %vm761_vm6, %v757_v58, %v1450_v57  ;;  %v775_v3 = vsel %vm761_vm6, %v758_v59, %v1451_v55 }
  0xe3   :  { %v1456_v63 = vunpack.i.h.bf16 %v1454_v62  ;;  %v1455_v0 = vunpack.i.l.bf16 %v1454_v62  ;;  %v1459_v1 = vpop.permute.xlu1 %1458 }
  0xe4   :  { %v1461_v15 = vunpack.i.h.bf16 %v1459_v1  ;;  %v1460_v39 = vunpack.i.l.bf16 %v1459_v1 }
  0xe5   :  { %v791_v4 = vsel %vm778_vm7, %v774_v2, %v1455_v0  ;;  %v792_v60 = vsel %vm778_vm7, %v775_v3, %v1456_v63 }
  0xe6   :  { %v808_v35 = vsel %vm795_vm8, %v791_v4, %v1460_v39  ;;  %v809_v5 = vsel %vm795_vm8, %v792_v60, %v1461_v15  ;;  %v1464_v6 = vpop.permute.xlu0 %1463 }
  0xe7   :  { %v1162_v7 = vpack.c.bf16 %v809_v5, %v808_v35  ;;  %v1466_v8 = vunpack.i.h.bf16 %v1464_v6  ;;  %v1465_v9 = vunpack.i.l.bf16 %v1464_v6  ;;  %v1469_v10 = vpop.permute.xlu1 %1468 }
  0xe8   :  { %v1471_v12 = vunpack.i.h.bf16 %v1469_v10  ;;  %v1470_v13 = vunpack.i.l.bf16 %v1469_v10 }
  0xe9   :  { %v691_v14 = vsel %vm676_vm0, %v1904_v21, %v1465_v9  ;;  %v692_v16 = vsel %vm676_vm0, %v1955_v45, %v1466_v8  ;;  %1164 = vmatpush3.bf16.xpose.msk.msra.mxu0 %vm2000_vm10, %v1162_v7 }
  0xea   :  { %v1474_v18 = vpop.permute.xlu0 %1473  ;;  %1165 = vmatprep.subr.bf16.mxu0 %v1530_v17  ;;  %v708_v24 = vsel %vm693_vm1, %v691_v14, %v1470_v13  ;;  %v709_v38 = vsel %vm693_vm1, %v692_v16, %v1471_v12 }
  0xeb   :  { %v1476_v19 = vunpack.i.h.bf16 %v1474_v18  ;;  %v1475_v22 = vunpack.i.l.bf16 %v1474_v18  ;;  %v1479_v23 = vpop.permute.xlu1 %1478 }
  0xec   :  { %v1481_v25 = vunpack.i.h.bf16 %v1479_v23  ;;  %v1480_v26 = vunpack.i.l.bf16 %v1479_v23 }
  0xed   :  { %v725_v21 = vsel %vm710_vm2, %v708_v24, %v1475_v22  ;;  %v726_v27 = vsel %vm710_vm2, %v709_v38, %v1476_v19 }
  0xee   :  { %v1484_v45 = vpop.permute.xlu0 %1483  ;;  %v742_v31 = vsel %vm727_vm3, %v725_v21, %v1480_v26  ;;  %v743_v17 = vsel %vm727_vm3, %v726_v27, %v1481_v25 }
  0xef   :  { %v1486_v28 = vunpack.i.h.bf16 %v1484_v45  ;;  %v1485_v29 = vunpack.i.l.bf16 %v1484_v45  ;;  %v1489_v30 = vpop.permute.xlu1 %1488 }
  0xf0   :  { %v1491_v32 = vunpack.i.h.bf16 %v1489_v30  ;;  %v1490_v33 = vunpack.i.l.bf16 %v1489_v30 }
  0xf1   :  { %v759_v34 = vsel %vm744_vm5, %v742_v31, %v1485_v29  ;;  %v760_v37 = vsel %vm744_vm5, %v743_v17, %v1486_v28 }
  0xf2   :  { %v1494_v56 = vpop.permute.xlu0 %1493  ;;  %v776_v42 = vsel %vm761_vm6, %v759_v34, %v1490_v33  ;;  %v777_v43 = vsel %vm761_vm6, %v760_v37, %v1491_v32 }
  0xf3   :  { %v1496_v40 = vunpack.i.h.bf16 %v1494_v56  ;;  %v1495_v11 = vunpack.i.l.bf16 %v1494_v56  ;;  %v1499_v41 = vpop.permute.xlu1 %1498 }
  0xf4   :  { %v1501_v44 = vunpack.i.h.bf16 %v1499_v41  ;;  %v1500_v46 = vunpack.i.l.bf16 %v1499_v41 }
  0xf5   :  { %v793_v48 = vsel %vm778_vm7, %v776_v42, %v1495_v11  ;;  %v794_v49 = vsel %vm778_vm7, %v777_v43, %v1496_v40 }
  0xf6   :  { %v810_v61 = vsel %vm795_vm8, %v793_v48, %v1500_v46  ;;  %v811_v50 = vsel %vm795_vm8, %v794_v49, %v1501_v44 }
  0xf7   :  { %v1166_v20 = vpack.c.bf16 %v811_v50, %v810_v61 }
  0xf9   :  { %1168 = vmatpush3.bf16.xpose.msk.msra.mxu0 %vm2000_vm10, %v1166_v20 }
 0x100   :  { %1135 = vmatmul.mubr.msk.f32.vlgmr.msra.gmra.mrb[0].mxu0 %vm819_vm9, %v812_v51 }
 0x103   :  { %v817_v52 = vpop.permute.xlu0 %816 }
 0x1d3   :  { %v937_v53 = vpop.f32.mrb[0].mxu0 }
 0x1d4   :  { %v938_v36 = vadd.f32 %v937_v53, %v817_v52  ;;  %v1136_v54 = vpop.f32.mrb[1].mxu0 }
 0x1d6   :  { %941 = vst [vmem:[#allocation2] sm:$0xf] %v938_v36 }
 0x1d7   :  { %1514 = shalt.err (!%p1511_p4)
}
 0x1d8   :  { %s1515_s1 = scalar_lea.hbm %s2174_s3, 64 }
 0x1d9   :  { %p1516_p5 = scmp.ne.s32.totalorder %s2174_s3, %s1515_s1  ;;  %p1519_p6 = scmp.lt.u32.totalorder %s1515_s1, %s2174_s3 }
 0x1db   :  { %p1521_p7 = pnand %p1519_p6, %p1516_p5 }
 0x1dd   :  { %1524 = shalt.err (!%p1521_p7)
}
 0x1de   :  { %951 = dma.vmem_to_hbm [thread:$0]  %s949_s24, 64, %s2174_s3, [#allocation3]  }
 0x1df   :  { %1525 = dma.done.wait [#allocation3], 64  }
 0x1e0   :  { %1526 = vsyncadd [#allocation3], 4294967232 }
 0x1e1   :  { %955 = vsyncpa [#allocation3], 1 }

</bundles_post_ra>
